<compile_context>
chip_gen: v6e
topology: v6e:2x2x1
jax: 0.10.0
libtpu: 0.0.40
codegen_flags: <defaults>
</compile_context>

<pallas_src>
import functools

import jax
import jax.numpy as jnp
from jax import lax
from jax.experimental import pallas as pl
from jax.experimental.pallas import tpu as pltpu


def _round_up(a, b):
    return (a + b - 1) // b * b


def _cdiv(a, b):
    return (a + b - 1) // b


def _vmem_capacity_bytes():
    """Physical VMEM of the current TPU generation (fallback: 128 MiB)."""
    try:
        info = pltpu.get_tpu_info()
    except Exception:
        return 128 << 20
    for attr in ("vmem_capacity_bytes", "vmem_size_bytes", "vmem_bytes"):
        v = getattr(info, attr, None)
        if v:
            return int(v)
    return 128 << 20


def _pick_row_tile(Ho, K, N, Wop, budget, est_bytes, max_rows=4096):
    """Largest output-row tile TH (multiple of K-1 for halo-block alignment) whose VMEM
    estimate fits the per-generation budget.  Megacore only needs N * n_ht >= 2."""
    align = max(K - 1, 1)
    th_cap = _round_up(Ho, align)
    fit = [t for t in range(align, th_cap + 1, align)
           if est_bytes(t) <= budget and t * Wop <= max_rows]
    TH = max(fit) if fit else align
    if N * _cdiv(Ho, TH) < 2 and _cdiv(Ho, align) >= 2:
        # single image: split H so both v7x TensorCores get work
        TH = min(TH, _round_up(_cdiv(Ho, 2), align))
    return TH


def _mask_conv_kernel(xm_ref, xh_ref, w_ref, o_ref, win_ref, acc_ref, *, K, precision):
    """One (batch, row-tile) grid step.

    xm_ref : (1, TH,   Wop, K*C)  main rows of the kw-folded, channels-last input
    xh_ref : (1, K-1,  Wop, K*C)  halo rows (first K-1 rows of the next tile)
    w_ref  : (K, K*C, Op)         row-tap weights, contraction = K*C
    o_ref  : (1, TH, Wop, Op)     output tile
    win_ref: (TH+K-1, Wop, K*C)   VMEM scratch: contiguous halo window
    acc_ref: (TH*Wop, Op) f32     VMEM accumulator (tap matmuls chain into it)
    """
    TH, Wop, KC = xm_ref.shape[1], xm_ref.shape[2], xm_ref.shape[3]
    # Assemble the (TH+K-1)-row window once (single aligned VMEM copy); all tap slices
    # below are row-plane offsets only -> no sublane/lane relayout per tap.
    win_ref[0:TH] = xm_ref[0]
    if K > 1:
        win_ref[TH:TH + K - 1] = xh_ref[0]
    # K unrolled row-tap matmuls, f32 accumulation into an explicit VMEM scratch so the
    # compiler can chain them into the MXU accumulator (MRB in-place accumulate on v7x).
    for kh in range(K):
        lhs = win_ref[kh:kh + TH].reshape(TH * Wop, KC)
        tap = jnp.dot(lhs, w_ref[kh], preferred_element_type=jnp.float32,
                      precision=precision)
        if kh == 0:
            acc_ref[...] = tap
        else:
            acc_ref[...] += tap
    o_ref[0] = acc_ref[...].reshape(TH, Wop, -1).astype(o_ref.dtype)


def mask_conv2d(x, mask, weight, *, padding=1, flag=3, compute_dtype=None,
                precision=None):
    """Pallas implementation of MaskConv2d.forward (flag=3/4 paths).

    flag=3: x.masked_fill(mask, 0) then Conv2d (bias=False);  flag=4: Conv2d only.
    x: (N, C, H, W);  mask: (N, C, H, W) bool;  weight: (O, C, K, K).
    compute_dtype: matmul-input dtype (e.g. jnp.bfloat16 on v6e/v7x); accumulation f32.
    precision: optional lax.Precision for the in-kernel dot (HIGHEST = bit-accurate f32).
    """
    if flag in (1, 2):
        # TODO(synk): Conv2d_selfAdapt (flag=1/2) is not defined in the reference source.
        raise NotImplementedError(
            "Conv2d_selfAdapt (flag=1/2) is not defined in the reference source")

    N, C, H, W = x.shape
    O, Cw, K, K2 = weight.shape
    assert Cw == C and K2 == K

    out_dtype = x.dtype
    cdt = jnp.dtype(compute_dtype) if compute_dtype is not None else jnp.dtype(x.dtype)

    p = padding
    Hp, Wp = H + 2 * p, W + 2 * p
    Ho, Wo = Hp - K + 1, Wp - K + 1          # stride=1, dilation=1
    assert Ho > 0 and Wo > 0

    sub_in = 16 if cdt.itemsize == 2 else 8
    Wop = _round_up(Wo, sub_in)              # keep the (TH,Wop,KC)->(TH*Wop,KC) merge free
    KC = K * C
    Kh = max(K - 1, 1)

    # Output-channel padding: lane-dense only when the padding cost is small.
    if O < 64:
        Op = O
    elif O >= 256:
        Op = _round_up(O, 256)               # fill the 2x256x256 MXU on v6e/v7x
    else:
        Op = _round_up(O, 128)

    # Generation-aware VMEM budget (v7x: 64 MiB physical -> ~32 MiB; v5e/v6e: ~64 MiB).
    cap = _vmem_capacity_bytes()
    budget = min(cap // 2, 64 << 20)
    ib, ob = cdt.itemsize, jnp.dtype(out_dtype).itemsize
    sub_out = 16 if ob == 2 else 8
    lane = 128

    def est_bytes(TH_):
        main = 2 * TH_ * _round_up(Wop, sub_in) * _round_up(KC, lane) * ib
        halo = 2 * Kh * _round_up(Wop, sub_in) * _round_up(KC, lane) * ib
        wgt = 2 * K * _round_up(KC, sub_in) * _round_up(Op, lane) * ib
        outb = 2 * TH_ * _round_up(Wop, sub_out) * _round_up(Op, lane) * ob
        win = (TH_ + K - 1) * _round_up(Wop, sub_in) * _round_up(KC, lane) * ib
        acc = _round_up(TH_ * Wop, 8) * _round_up(Op, lane) * 4
        return main + halo + wgt + outb + win + acc

    TH = _pick_row_tile(Ho, K, N, Wop, budget, est_bytes)
    n_ht = _cdiv(Ho, TH)
    Hpo = n_ht * TH                          # H rows computed (>= Ho; tail sliced away)
    Hp_pad = Hpo + Kh                        # padded input height (covers last halo)
    Wp_pad = Wop + K - 1                     # padded input width  (covers kw shifts)

    # masked_fill + NCHW->NHWC + spatial zero-pad + kw-fold: all fused by XLA into the
    # one relayout pass the channels-last kernel needs anyway (no bool mask and no
    # halo-duplicated tile copy is ever written to HBM).
    x1 = jnp.where(mask, 0.0, x) if flag != 4 else x
    x1 = jnp.transpose(x1, (0, 2, 3, 1))                               # (N, H, W, C)
    x1 = jnp.pad(x1, ((0, 0), (p, Hp_pad - H - p), (p, Wp_pad - W - p), (0, 0)))
    # kw folded onto the channel/lane dim: xe[..., w, kw*C + c] = x1[..., w + kw, c]
    xe = jnp.stack([x1[:, :, kw:kw + Wop, :] for kw in range(K)], axis=3)
    xe = xe.reshape(N, Hp_pad, Wop, KC).astype(cdt)

    # weight -> (K, K*C, Op): row-tap major, contraction (K*C) on sublanes, O on lanes.
    w2 = jnp.transpose(weight, (2, 3, 1, 0)).reshape(K, KC, O)
    if Op != O:
        w2 = jnp.pad(w2, ((0, 0), (0, 0), (0, Op - O)))
    w2 = w2.astype(cdt)

    est = est_bytes(TH)
    vmem_limit = int(min(max(4 << 20, est + est // 4 + (1 << 20)), cap - (2 << 20)))

    halo_step = TH // Kh                     # halo block index stride (TH % (K-1) == 0)
    kernel = functools.partial(_mask_conv_kernel, K=K, precision=precision)

    out = pl.pallas_call(
        kernel,
        out_shape=jax.ShapeDtypeStruct((N, Hpo, Wop, Op), out_dtype),
        grid_spec=pltpu.PrefetchScalarGridSpec(
            num_scalar_prefetch=0,
            grid=(N, n_ht),
            in_specs=[
                # main TH rows of the tile
                pl.BlockSpec((1, TH, Wop, KC), lambda n, hi: (n, hi, 0, 0)),
                # K-1 halo rows = first rows of the next tile (same array, 2nd view)
                pl.BlockSpec((1, Kh, Wop, KC),
                             lambda n, hi: (n, (hi + 1) * halo_step, 0, 0)),
                # tap weights, revisited (loaded once)
                pl.BlockSpec((K, KC, Op), lambda n, hi: (0, 0, 0)),
            ],
            out_specs=pl.BlockSpec((1, TH, Wop, Op), lambda n, hi: (n, hi, 0, 0)),
            scratch_shapes=[
                pltpu.VMEM((TH + K - 1, Wop, KC), cdt),      # halo window
                pltpu.VMEM((TH * Wop, Op), jnp.float32),     # f32 accumulator
            ],
        ),
        compiler_params=pltpu.CompilerParams(
            dimension_semantics=("parallel", "parallel"),
            vmem_limit_bytes=vmem_limit,
        ),
    )(xe, xe, w2)

    # drop row/col/channel padding, back to NCHW
    out = out[:, :Ho, :Wo, :O]
    out = jnp.transpose(out, (0, 3, 1, 2))
    return out


if __name__ == "__main__":
    key = jax.random.PRNGKey(0)
    kx, km, kw = jax.random.split(key, 3)

    N, C, H, W = 2, 4, 16, 16
    O, K = 4, 3

    x = jax.random.normal(kx, (N, C, H, W), dtype=jnp.float32)
    mask = jax.random.uniform(km, (N, C, H, W)) < 0.3  # bool mask (True == fill with 0)
    # Deterministic weight init (kaiming-uniform-like scale, bias=False as in module)
    fan_in = C * K * K
    bound = 1.0 / (fan_in ** 0.5)
    weight = jax.random.uniform(kw, (O, C, K, K), minval=-bound, maxval=bound,
                                dtype=jnp.float32)

    # flag=3: masked_fill + conv, f32 compute
    out = mask_conv2d(x, mask, weight, padding=1, flag=3)
    jax.block_until_ready(out)

    x1 = jnp.where(mask, 0.0, x)
    ref = lax.conv_general_dilated(
        x1, weight, window_strides=(1, 1), padding=((1, 1), (1, 1)),
        dimension_numbers=("NCHW", "OIHW", "NCHW"))
    assert out.shape == (N, O, H, W)
    assert jnp.allclose(out, ref, atol=1e-4, rtol=1e-4)

    # flag=4: mask ignored
    out4 = mask_conv2d(x, mask, weight, padding=1, flag=4)
    ref4 = lax.conv_general_dilated(
        x, weight, window_strides=(1, 1), padding=((1, 1), (1, 1)),
        dimension_numbers=("NCHW", "OIHW", "NCHW"))
    assert jnp.allclose(out4, ref4, atol=1e-4, rtol=1e-4)

    # bf16 compute path (perf option for v6e/v7x MXU + halved DMA).  Compare against a
    # reference with the same bf16-quantized inputs so only accumulation noise remains.
    out_bf = mask_conv2d(x, mask, weight, padding=1, flag=3,
                         compute_dtype=jnp.bfloat16)
    x1_q = x1.astype(jnp.bfloat16).astype(jnp.float32)
    w_q = weight.astype(jnp.bfloat16).astype(jnp.float32)
    ref_bf = lax.conv_general_dilated(
        x1_q, w_q, window_strides=(1, 1), padding=((1, 1), (1, 1)),
        dimension_numbers=("NCHW", "OIHW", "NCHW"))
    assert jnp.allclose(out_bf, ref_bf, atol=2e-2, rtol=2e-2)

    print("KERNEL_OK")
</pallas_src>

<mosaic_0001>
module attributes {stable_mosaic.version = 11 : i64} {
  func.func @_mask_conv_kernel(%arg0: i32, %arg1: i32, %arg2: memref<1x16x16x12xf32, #tpu.memory_space<vmem>>, %arg3: memref<1x2x16x12xf32, #tpu.memory_space<vmem>>, %arg4: memref<3x12x4xf32, #tpu.memory_space<vmem>>, %arg5: memref<1x16x16x4xf32, #tpu.memory_space<vmem>>, %arg6: memref<18x16x12xf32, #tpu.memory_space<vmem>>, %arg7: memref<256x4xf32, #tpu.memory_space<vmem>>) attributes {dimension_semantics = [#tpu.dimension_semantics<parallel>, #tpu.dimension_semantics<parallel>], iteration_bounds = array<i64: 2, 1>, scalar_prefetch = 0 : i64, scratch_operands = 2 : i64, tpu.core_type = #tpu.core_type<tc>, window_params = [{transform_indices = @transform_0, window_bounds = array<i64: 1, 16, 16, 12>}, {transform_indices = @transform_1, window_bounds = array<i64: 1, 2, 16, 12>}, {pipeline_mode = #tpu.pipeline_mode<synchronous>, transform_indices = @transform_2, window_bounds = array<i64: 3, 12, 4>}, {transform_indices = @transform_3, window_bounds = array<i64: 1, 16, 16, 4>}]} {
    %c0 = arith.constant 0 : index
    %c0_0 = arith.constant 0 : index
    %c0_1 = arith.constant 0 : index
    %c0_2 = arith.constant 0 : index
    %0 = vector.load %arg2[%c0, %c0_0, %c0_1, %c0_2] : memref<1x16x16x12xf32, #tpu.memory_space<vmem>>, vector<1x16x16x12xf32>
    %1 = vector.shape_cast %0 : vector<1x16x16x12xf32> to vector<16x16x12xf32>
    %c0_3 = arith.constant 0 : index
    %c0_4 = arith.constant 0 : index
    %c0_5 = arith.constant 0 : index
    %2 = vector.load %arg6[%c0_3, %c0_4, %c0_5] : memref<18x16x12xf32, #tpu.memory_space<vmem>>, vector<16x16x12xf32>
    tpu.vector_store %arg6[%c0_3, %c0_4, %c0_5], %1 {strides = array<i32>} : memref<18x16x12xf32, #tpu.memory_space<vmem>>, vector<16x16x12xf32>,
    %c0_6 = arith.constant 0 : index
    %c0_7 = arith.constant 0 : index
    %c0_8 = arith.constant 0 : index
    %c0_9 = arith.constant 0 : index
    %3 = vector.load %arg3[%c0_6, %c0_7, %c0_8, %c0_9] : memref<1x2x16x12xf32, #tpu.memory_space<vmem>>, vector<1x2x16x12xf32>
    %4 = vector.shape_cast %3 : vector<1x2x16x12xf32> to vector<2x16x12xf32>
    %c16 = arith.constant 16 : index
    %c0_10 = arith.constant 0 : index
    %c0_11 = arith.constant 0 : index
    %5 = vector.load %arg6[%c16, %c0_10, %c0_11] : memref<18x16x12xf32, #tpu.memory_space<vmem>>, vector<2x16x12xf32>
    tpu.vector_store %arg6[%c16, %c0_10, %c0_11], %4 {strides = array<i32>} : memref<18x16x12xf32, #tpu.memory_space<vmem>>, vector<2x16x12xf32>,
    %c0_12 = arith.constant 0 : index
    %c0_13 = arith.constant 0 : index
    %c0_14 = arith.constant 0 : index
    %6 = vector.load %arg6[%c0_12, %c0_13, %c0_14] : memref<18x16x12xf32, #tpu.memory_space<vmem>>, vector<16x16x12xf32>
    %7 = vector.shape_cast %6 : vector<16x16x12xf32> to vector<256x12xf32>
    %c0_15 = arith.constant 0 : index
    %c0_16 = arith.constant 0 : index
    %c0_17 = arith.constant 0 : index
    %8 = vector.load %arg4[%c0_15, %c0_16, %c0_17] : memref<3x12x4xf32, #tpu.memory_space<vmem>>, vector<1x12x4xf32>
    %9 = vector.shape_cast %8 : vector<1x12x4xf32> to vector<12x4xf32>
    %cst = arith.constant dense<0.000000e+00> : vector<256x4xf32>
    %10 = tpu.matmul %7, %9, %cst {dimension_numbers = #tpu.dot_dimension_numbers<[1], [0], [0], [1], [0, 0, 1, 1], [], []>} : vector<256x12xf32>, vector<12x4xf32>, vector<256x4xf32> -> vector<256x4xf32>
    %c0_18 = arith.constant 0 : index
    %c0_19 = arith.constant 0 : index
    %11 = vector.load %arg7[%c0_18, %c0_19] : memref<256x4xf32, #tpu.memory_space<vmem>>, vector<256x4xf32>
    tpu.vector_store %arg7[%c0_18, %c0_19], %10 {strides = array<i32>} : memref<256x4xf32, #tpu.memory_space<vmem>>, vector<256x4xf32>,
    %c1 = arith.constant 1 : index
    %c0_20 = arith.constant 0 : index
    %c0_21 = arith.constant 0 : index
    %12 = vector.load %arg6[%c1, %c0_20, %c0_21] : memref<18x16x12xf32, #tpu.memory_space<vmem>>, vector<16x16x12xf32>
    %13 = vector.shape_cast %12 : vector<16x16x12xf32> to vector<256x12xf32>
    %c1_22 = arith.constant 1 : index
    %c0_23 = arith.constant 0 : index
    %c0_24 = arith.constant 0 : index
    %14 = vector.load %arg4[%c1_22, %c0_23, %c0_24] : memref<3x12x4xf32, #tpu.memory_space<vmem>>, vector<1x12x4xf32>
    %15 = vector.shape_cast %14 : vector<1x12x4xf32> to vector<12x4xf32>
    %cst_25 = arith.constant dense<0.000000e+00> : vector<256x4xf32>
    %16 = tpu.matmul %13, %15, %cst_25 {dimension_numbers = #tpu.dot_dimension_numbers<[1], [0], [0], [1], [0, 0, 1, 1], [], []>} : vector<256x12xf32>, vector<12x4xf32>, vector<256x4xf32> -> vector<256x4xf32>
    %c0_26 = arith.constant 0 : index
    %c0_27 = arith.constant 0 : index
    %17 = vector.load %arg7[%c0_26, %c0_27] : memref<256x4xf32, #tpu.memory_space<vmem>>, vector<256x4xf32>
    %18 = arith.addf %17, %16 : vector<256x4xf32>
    %c0_28 = arith.constant 0 : index
    %c0_29 = arith.constant 0 : index
    %19 = vector.load %arg7[%c0_28, %c0_29] : memref<256x4xf32, #tpu.memory_space<vmem>>, vector<256x4xf32>
    tpu.vector_store %arg7[%c0_28, %c0_29], %18 {strides = array<i32>} : memref<256x4xf32, #tpu.memory_space<vmem>>, vector<256x4xf32>,
    %c2 = arith.constant 2 : index
    %c0_30 = arith.constant 0 : index
    %c0_31 = arith.constant 0 : index
    %20 = vector.load %arg6[%c2, %c0_30, %c0_31] : memref<18x16x12xf32, #tpu.memory_space<vmem>>, vector<16x16x12xf32>
    %21 = vector.shape_cast %20 : vector<16x16x12xf32> to vector<256x12xf32>
    %c2_32 = arith.constant 2 : index
    %c0_33 = arith.constant 0 : index
    %c0_34 = arith.constant 0 : index
    %22 = vector.load %arg4[%c2_32, %c0_33, %c0_34] : memref<3x12x4xf32, #tpu.memory_space<vmem>>, vector<1x12x4xf32>
    %23 = vector.shape_cast %22 : vector<1x12x4xf32> to vector<12x4xf32>
    %cst_35 = arith.constant dense<0.000000e+00> : vector<256x4xf32>
    %24 = tpu.matmul %21, %23, %cst_35 {dimension_numbers = #tpu.dot_dimension_numbers<[1], [0], [0], [1], [0, 0, 1, 1], [], []>} : vector<256x12xf32>, vector<12x4xf32>, vector<256x4xf32> -> vector<256x4xf32>
    %c0_36 = arith.constant 0 : index
    %c0_37 = arith.constant 0 : index
    %25 = vector.load %arg7[%c0_36, %c0_37] : memref<256x4xf32, #tpu.memory_space<vmem>>, vector<256x4xf32>
    %26 = arith.addf %25, %24 : vector<256x4xf32>
    %c0_38 = arith.constant 0 : index
    %c0_39 = arith.constant 0 : index
    %27 = vector.load %arg7[%c0_38, %c0_39] : memref<256x4xf32, #tpu.memory_space<vmem>>, vector<256x4xf32>
    tpu.vector_store %arg7[%c0_38, %c0_39], %26 {strides = array<i32>} : memref<256x4xf32, #tpu.memory_space<vmem>>, vector<256x4xf32>,
    %c0_40 = arith.constant 0 : index
    %c0_41 = arith.constant 0 : index
    %28 = vector.load %arg7[%c0_40, %c0_41] : memref<256x4xf32, #tpu.memory_space<vmem>>, vector<256x4xf32>
    %29 = vector.shape_cast %28 : vector<256x4xf32> to vector<16x16x4xf32>
    %c0_42 = arith.constant 0 : index
    %c0_43 = arith.constant 0 : index
    %c0_44 = arith.constant 0 : index
    %c0_45 = arith.constant 0 : index
    %30 = vector.load %arg5[%c0_42, %c0_43, %c0_44, %c0_45] : memref<1x16x16x4xf32, #tpu.memory_space<vmem>>, vector<1x16x16x4xf32>
    %31 = vector.shape_cast %30 : vector<1x16x16x4xf32> to vector<16x16x4xf32>
    %32 = vector.shape_cast %29 : vector<16x16x4xf32> to vector<1x16x16x4xf32>
    tpu.vector_store %arg5[%c0_42, %c0_43, %c0_44, %c0_45], %32 {strides = array<i32>} : memref<1x16x16x4xf32, #tpu.memory_space<vmem>>, vector<1x16x16x4xf32>,
    return
  }
  func.func @transform_0(%arg0: i32, %arg1: i32) -> (i32, i32, i32, i32) {
    %c0_i32 = arith.constant 0 : i32
    %c0_i32_0 = arith.constant 0 : i32
    %c0_i32_1 = arith.constant 0 : i32
    return %arg0, %arg1, %c0_i32, %c0_i32_0 : i32, i32, i32, i32
  }
  func.func @transform_1(%arg0: i32, %arg1: i32) -> (i32, i32, i32, i32) {
    %c1_i32 = arith.constant 1 : i32
    %0 = arith.addi %arg1, %c1_i32 : i32
    %c8_i32 = arith.constant 8 : i32
    %1 = arith.muli %0, %c8_i32 : i32
    %c0_i32 = arith.constant 0 : i32
    %c0_i32_0 = arith.constant 0 : i32
    %c0_i32_1 = arith.constant 0 : i32
    return %arg0, %1, %c0_i32, %c0_i32_0 : i32, i32, i32, i32
  }
  func.func @transform_2(%arg0: i32, %arg1: i32) -> (i32, i32, i32) {
    %c0_i32 = arith.constant 0 : i32
    %c0_i32_0 = arith.constant 0 : i32
    %c0_i32_1 = arith.constant 0 : i32
    %c0_i32_2 = arith.constant 0 : i32
    return %c0_i32, %c0_i32_0, %c0_i32_1 : i32, i32, i32
  }
  func.func @transform_3(%arg0: i32, %arg1: i32) -> (i32, i32, i32, i32) {
    %c0_i32 = arith.constant 0 : i32
    %c0_i32_0 = arith.constant 0 : i32
    %c0_i32_1 = arith.constant 0 : i32
    return %arg0, %arg1, %c0_i32, %c0_i32_0 : i32, i32, i32, i32
  }
}

</mosaic_0001>

<bundles_post_ra>
// kernel: tpu_custom_call.1
= control target key start
LH: loop header
LB: loop body
LE: loop exit
PB: predicated region body
PF: predicated region fallthrough
CT: control target
= control target key end

     0   :  { %s2302_s12 = smov 0   ;;  %s2304_s13 = smov 0   ;;  %s2811_s0 = inlined_call_operand.vmem [shape: f32[2,18,16,12], index: 0, kind: input, shape index: {}]   ;;  %s2812_s1 = inlined_call_operand.vmem [shape: f32[2,18,16,12], index: 1, kind: input, shape index: {}]   ;;  %s2813_s2 = inlined_call_operand.vmem [shape: f32[3,12,4], index: 2, kind: input, shape index: {}]   ;;  %s2814_s3 = inlined_call_operand.vmem [shape: f32[2,16,16,4], index: 3, kind: output, shape index: {}]  }
   0x1   :  { %s2306_s14 = smov 0  }
   0x2 LB: > { %s25_s15 = sadd.s32 1, %s2276_s13  ;;  %p1856_p0 = scmp.ge.s32.totalorder %s2280_s14, 1  ;;  %s2280_s14 = sphi %s2306_s14, %s13_s14   ;;  %s2276_s13 = sphi %s2304_s13, %s2816_s13   ;;  %s2272_s12 = sphi %s2302_s12, %s2815_s12  }
   0x3   : > { %p27_p1 = scmp.ge.s32.totalorder %s25_s15, 2  ;;  %p195_p2 = scmp.lt.s32.totalorder %s2280_s14, 3 }
   0x5   : > { %s2818_s15 = smov (%p27_p1, %s25_s15), 0  ;;  %p196_p3 = pnand %p1856_p0, %p195_p2 }
   0x6   : > { %p252_p4 = scmp.lt.s32.totalorder (!%p196_p3), %s2272_s12, 1 }
   0x7   : > { %199 = sbr.rel (%p196_p3) target bundleno = 337 (0x151), region = 32 }
   0xc   : > { %v400_v0 = vld [vmem:[%s2813_s2 + $0x8] sm:$0xf]  ;;  %vm497_vm0 = vcmask 1043456   ;;  %v399_v1 = vld [vmem:[%s2813_s2] sm:$0xff]  ;;  %s2820_s12 = smov (!%p252_p4, %s2272_s12), 1  ;;  %vm325_vm1 = vcmask 97280  }
   0xd   : > { %2227 = vmatprep.subr.msk.mxu1 %vm497_vm0, %v400_v0  ;;  %2071 = vmatprep.subr.msk.mxu0 %vm497_vm0, %v400_v0  ;;  %v2334_v2 = vld [vmem:[%s2813_s2 + $0x18] sm:$0xf]  ;;  %v2340_v3 = vld [vmem:[%s2813_s2 + $0x28] sm:$0xf]  ;;  %s2231_s24 = smul.u32 288, %s2820_s12  ;;  %v1894_v32 = vld [vmem:[%s2813_s2 + $0x10] sm:$0xff] }
   0xe   : > { %2229 = vmatpush3.msk.msra.mxu1 %vm497_vm0, %v400_v0  ;;  %2072 = vmatpush3.msk.msra.mxu0 %vm497_vm0, %v400_v0  ;;  %v1929_v36 = vld [vmem:[%s2813_s2 + $0x20] sm:$0xff]  ;;  %vm726_vm2 = vcmask 31744   ;;  %s1968_s9 = sshll.u32 %s2820_s12, 8 }
   0xf   : > { %2228 = vmatprep.subr.mxu1 %v399_v1  ;;  %2073 = vmatprep.subr.mxu0 %v399_v1  ;;  %s2352_s27 = scalar_lea.vmem %s2811_s0, %s2231_s24  ;;  %s1967_s5 = sadd.s32 256, %s2231_s24 }
  0x10   : > { %2230 = vmatpush3.msra.mxu1 %v399_v1  ;;  %2074 = vmatpush3.msra.mxu0 %v399_v1  ;;  %v309_v4 = vld [vmem:[%s2352_s27 + $0x80] sm:$0xff]  ;;  %v310_v5 = vld [vmem:[%s2352_s27 + $0x88] sm:$0xff]  ;;  %v311_v6 = vld [vmem:[%s2352_s27 + $0x90] sm:$0xff]  ;;  %s278_s8 = scalar_lea.vmem %s2812_s1, %s1967_s5  ;;  %s2683_s12 = scalar_lea.vmem %s2814_s3, %s1968_s9 }
  0x11   : > { %2123 = vmatprep.subr.msk.mxu1 %vm497_vm0, %v2334_v2  ;;  %2175 = vmatprep.subr.msk.mxu0 %vm497_vm0, %v2340_v3  ;;  %342 = vst.msk [vmem:[#allocation2 + $0x80] sm:$0xff] %vm325_vm1, %v309_v4  ;;  %343 = vst.msk [vmem:[#allocation2 + $0x88] sm:$0xff] %vm325_vm1, %v310_v5  ;;  %v312_v7 = vld [vmem:[%s2352_s27 + $0x98] sm:$0xff]  ;;  %v293_v8 = vld [vmem:[%s2352_s27] sm:$0xff] }
  0x12   : > { %344 = vst.msk [vmem:[#allocation2 + $0x90] sm:$0xff] %vm325_vm1, %v311_v6  ;;  %v313_v9 = vld [vmem:[%s2352_s27 + $0xa0] sm:$0xff]  ;;  %345 = vst.msk [vmem:[#allocation2 + $0x98] sm:$0xff] %vm325_vm1, %v312_v7  ;;  %v294_v10 = vld [vmem:[%s2352_s27 + $0x8] sm:$0xff] }
  0x13   : > { %326 = vst.msk [vmem:[#allocation2] sm:$0xff] %vm325_vm1, %v293_v8  ;;  %346 = vst.msk [vmem:[#allocation2 + $0xa0] sm:$0xff] %vm325_vm1, %v313_v9  ;;  %v314_v11 = vld [vmem:[%s2352_s27 + $0xa8] sm:$0xff]  ;;  %v295_v12 = vld [vmem:[%s2352_s27 + $0x10] sm:$0xff] }
  0x14   : > { %327 = vst.msk [vmem:[#allocation2 + $0x8] sm:$0xff] %vm325_vm1, %v294_v10  ;;  %347 = vst.msk [vmem:[#allocation2 + $0xa8] sm:$0xff] %vm325_vm1, %v314_v11  ;;  %v315_v13 = vld [vmem:[%s2352_s27 + $0xb0] sm:$0xff]  ;;  %v296_v14 = vld [vmem:[%s2352_s27 + $0x18] sm:$0xff] }
  0x15   : > { %328 = vst.msk [vmem:[#allocation2 + $0x10] sm:$0xff] %vm325_vm1, %v295_v12  ;;  %v316_v15 = vld [vmem:[%s2352_s27 + $0xb8] sm:$0xff]  ;;  %348 = vst.msk [vmem:[#allocation2 + $0xb0] sm:$0xff] %vm325_vm1, %v315_v13  ;;  %v297_v16 = vld [vmem:[%s2352_s27 + $0x20] sm:$0xff] }
  0x16   : > { %329 = vst.msk [vmem:[#allocation2 + $0x18] sm:$0xff] %vm325_vm1, %v296_v14  ;;  %349 = vst.msk [vmem:[#allocation2 + $0xb8] sm:$0xff] %vm325_vm1, %v316_v15  ;;  %v317_v17 = vld [vmem:[%s2352_s27 + $0xc0] sm:$0xff]  ;;  %v298_v18 = vld [vmem:[%s2352_s27 + $0x28] sm:$0xff] }
  0x17   : > { %330 = vst.msk [vmem:[#allocation2 + $0x20] sm:$0xff] %vm325_vm1, %v297_v16  ;;  %350 = vst.msk [vmem:[#allocation2 + $0xc0] sm:$0xff] %vm325_vm1, %v317_v17  ;;  %v318_v19 = vld [vmem:[%s2352_s27 + $0xc8] sm:$0xff]  ;;  %v299_v20 = vld [vmem:[%s2352_s27 + $0x30] sm:$0xff] }
  0x18   : > { %331 = vst.msk [vmem:[#allocation2 + $0x28] sm:$0xff] %vm325_vm1, %v298_v18  ;;  %v319_v21 = vld [vmem:[%s2352_s27 + $0xd0] sm:$0xff]  ;;  %351 = vst.msk [vmem:[#allocation2 + $0xc8] sm:$0xff] %vm325_vm1, %v318_v19  ;;  %v300_v22 = vld [vmem:[%s2352_s27 + $0x38] sm:$0xff] }
  0x19   : > { %332 = vst.msk [vmem:[#allocation2 + $0x30] sm:$0xff] %vm325_vm1, %v299_v20  ;;  %352 = vst.msk [vmem:[#allocation2 + $0xd0] sm:$0xff] %vm325_vm1, %v319_v21  ;;  %v320_v23 = vld [vmem:[%s2352_s27 + $0xd8] sm:$0xff]  ;;  %v301_v24 = vld [vmem:[%s2352_s27 + $0x40] sm:$0xff] }
  0x1a   : > { %333 = vst.msk [vmem:[#allocation2 + $0x38] sm:$0xff] %vm325_vm1, %v300_v22  ;;  %353 = vst.msk [vmem:[#allocation2 + $0xd8] sm:$0xff] %vm325_vm1, %v320_v23  ;;  %v321_v25 = vld [vmem:[%s2352_s27 + $0xe0] sm:$0xff]  ;;  %v302_v26 = vld [vmem:[%s2352_s27 + $0x48] sm:$0xff] }
  0x1b   : > { %334 = vst.msk [vmem:[#allocation2 + $0x40] sm:$0xff] %vm325_vm1, %v301_v24  ;;  %v322_v27 = vld [vmem:[%s2352_s27 + $0xe8] sm:$0xff]  ;;  %v2399_v28 = vld [vmem:[#allocation2 + $0x80] sm:$0xff]  ;;  %v2403_v30 = vld [vmem:[#allocation2 + $0x90] sm:$0xff] }
  0x1c   : > { %v2401_v29 = vld [vmem:[#allocation2 + $0x88] sm:$0xff]  ;;  %354 = vst.msk [vmem:[#allocation2 + $0xe0] sm:$0xff] %vm325_vm1, %v321_v25  ;;  %335 = vst.msk [vmem:[#allocation2 + $0x48] sm:$0xff] %vm325_vm1, %v302_v26  ;;  %2099 = vmatprep.mubr.msk.f32.mxu1 %vm325_vm1, %v2399_v28  ;;  %v367_v31 = vld [vmem:[#allocation2] sm:$0xff] }
  0x1d   : > { %355 = vst.msk [vmem:[#allocation2 + $0xe8] sm:$0xff] %vm325_vm1, %v322_v27  ;;  %2100 = vmatmul.mubr.msk.f32.vlgmr.msra.gmra.mxu1 %vm325_vm1, %v2401_v29  ;;  %2075 = vmatprep.mubr.msk.f32.mxu0 %vm325_vm1, %v367_v31  ;;  %v368_v33 = vld [vmem:[#allocation2 + $0x8] sm:$0xff]  ;;  %v2416_v34 = vld [vmem:[#allocation2 + $0x10] sm:$0xff]  ;;  %v2422_v35 = vld [vmem:[#allocation2 + $0x98] sm:$0xff] }
  0x1e   : > { %2124 = vmatpush3.msk.msra.mxu1 %vm497_vm0, %v2334_v2  ;;  %2102 = vmatprep.mubr.msk.f32.mxu1 %vm325_vm1, %v2403_v30  ;;  %v2427_v37 = vld [vmem:[#allocation2 + $0xa0] sm:$0xff]  ;;  %v2436_v38 = vld [vmem:[#allocation2 + $0x18] sm:$0xff]  ;;  %v2444_v40 = vld [vmem:[#allocation2 + $0xa8] sm:$0xff] }
  0x1f   : > { %2076 = vmatmul.mubr.msk.f32.vlgmr.msra.gmra.mxu0 %vm325_vm1, %v368_v33  ;;  %2125 = vmatprep.subr.mxu1 %v1894_v32  ;;  %v2440_v39 = vld [vmem:[#allocation2 + $0x20] sm:$0xff]  ;;  %v2446_v41 = vld [vmem:[#allocation2 + $0xb0] sm:$0xff]  ;;  %v2448_v42 = vld [vmem:[#allocation2 + $0x28] sm:$0xff] }
  0x20   : > { %2176 = vmatpush3.msk.msra.mxu0 %vm497_vm0, %v2340_v3  ;;  %2078 = vmatprep.mubr.msk.f32.mxu0 %vm325_vm1, %v2416_v34  ;;  %v2455_v43 = vld [vmem:[#allocation2 + $0x30] sm:$0xff]  ;;  %v304_v46 = vld [vmem:[%s2352_s27 + $0x58] sm:$0xff]  ;;  %v305_v49 = vld [vmem:[%s2352_s27 + $0x60] sm:$0xff] }
  0x21   : > { %2103 = vmatmul.mubr.msk.f32.gmra.mxu1 %vm325_vm1, %v2422_v35  ;;  %2177 = vmatprep.subr.mxu0 %v1929_v36  ;;  %v303_v44 = vld [vmem:[%s2352_s27 + $0x50] sm:$0xff]  ;;  %v2460_v47 = vld [vmem:[#allocation2 + $0xb8] sm:$0xff]  ;;  %337 = vst.msk [vmem:[#allocation2 + $0x58] sm:$0xff] %vm325_vm1, %v304_v46  ;;  %v306_v50 = vld [vmem:[%s2352_s27 + $0x68] sm:$0xff] }
  0x22   : > { %2105 = vmatprep.mubr.msk.f32.mxu1 %vm325_vm1, %v2427_v37  ;;  %2126 = vmatpush3.msra.mxu1 %v1894_v32  ;;  %v323_v45 = vld [vmem:[%s2352_s27 + $0xf0] sm:$0xff]  ;;  %336 = vst.msk [vmem:[#allocation2 + $0x50] sm:$0xff] %vm325_vm1, %v303_v44  ;;  %v324_v48 = vld [vmem:[%s2352_s27 + $0xf8] sm:$0xff]  ;;  %338 = vst.msk [vmem:[#allocation2 + $0x60] sm:$0xff] %vm325_vm1, %v305_v49 }
  0x23   : > { %2079 = vmatmul.mubr.msk.f32.gmra.mxu0 %vm325_vm1, %v2436_v38  ;;  %356 = vst.msk [vmem:[#allocation2 + $0xf0] sm:$0xff] %vm325_vm1, %v323_v45  ;;  %357 = vst.msk [vmem:[#allocation2 + $0xf8] sm:$0xff] %vm325_vm1, %v324_v48  ;;  %v307_v51 = vld [vmem:[%s2352_s27 + $0x70] sm:$0xff]  ;;  %v308_v52 = vld [vmem:[%s2352_s27 + $0x78] sm:$0xff] }
  0x24   : > { %2081 = vmatprep.mubr.msk.f32.mxu0 %vm325_vm1, %v2440_v39  ;;  %2178 = vmatpush3.msra.mxu0 %v1929_v36  ;;  %339 = vst.msk [vmem:[#allocation2 + $0x68] sm:$0xff] %vm325_vm1, %v306_v50  ;;  %v358_v53 = vld [vmem:[%s278_s8] sm:$0xff]  ;;  %340 = vst.msk [vmem:[#allocation2 + $0x70] sm:$0xff] %vm325_vm1, %v307_v51  ;;  %v359_v54 = vld [vmem:[%s278_s8 + $0x8] sm:$0xff] }
  0x25   : > { %2106 = vmatmul.mubr.msk.f32.gmra.mxu1 %vm325_vm1, %v2444_v40  ;;  %341 = vst.msk [vmem:[#allocation2 + $0x78] sm:$0xff] %vm325_vm1, %v308_v52  ;;  %363 = vst.msk [vmem:[#allocation2 + $0x100] sm:$0xff] %vm325_vm1, %v358_v53  ;;  %v360_v55 = vld [vmem:[%s278_s8 + $0x10] sm:$0xff]  ;;  %v361_v56 = vld [vmem:[%s278_s8 + $0x18] sm:$0xff] }
  0x26   : > { %2108 = vmatprep.mubr.msk.f32.mxu1 %vm325_vm1, %v2446_v41  ;;  %v2482_v57 = vld [vmem:[#allocation2 + $0xc0] sm:$0xff]  ;;  %364 = vst.msk [vmem:[#allocation2 + $0x108] sm:$0xff] %vm325_vm1, %v359_v54  ;;  %365 = vst.msk [vmem:[#allocation2 + $0x110] sm:$0xff] %vm325_vm1, %v360_v55  ;;  %v374_v58 = vld [vmem:[#allocation2 + $0x38] sm:$0xff] }
  0x27   : > { %2082 = vmatmul.mubr.msk.f32.gmra.mxu0 %vm325_vm1, %v2448_v42  ;;  %366 = vst.msk [vmem:[#allocation2 + $0x118] sm:$0xff] %vm325_vm1, %v361_v56  ;;  %v375_v59 = vld [vmem:[#allocation2 + $0x40] sm:$0xff]  ;;  %v2495_v60 = vld [vmem:[#allocation2 + $0xc8] sm:$0xff]  ;;  %v2497_v61 = vld [vmem:[#allocation2 + $0xd0] sm:$0xff] }
  0x28   : > { %2084 = vmatprep.mubr.msk.f32.mxu0 %vm325_vm1, %v2455_v43  ;;  %v376_v62 = vld [vmem:[#allocation2 + $0x48] sm:$0xff]  ;;  %v2505_v0 = vld [vmem:[#allocation2 + $0xd8] sm:$0xff]  ;;  %v2507_v1 = vld [vmem:[#allocation2 + $0xe0] sm:$0xff] }
  0x29   : > { %2109 = vmatmul.mubr.msk.f32.gmra.mxu1 %vm325_vm1, %v2460_v47  ;;  %v377_v63 = vld [vmem:[#allocation2 + $0x50] sm:$0xff]  ;;  %v378_v2 = vld [vmem:[#allocation2 + $0x58] sm:$0xff]  ;;  %v379_v3 = vld [vmem:[#allocation2 + $0x60] sm:$0xff] }
  0x2a   : > { %2111 = vmatprep.mubr.msk.f32.mxu1 %vm325_vm1, %v2482_v57  ;;  %v2515_v4 = vld [vmem:[#allocation2 + $0xe8] sm:$0xff]  ;;  %v2517_v5 = vld [vmem:[#allocation2 + $0xf0] sm:$0xff]  ;;  %v2525_v8 = vld [vmem:[#allocation2 + $0xf8] sm:$0xff] }
  0x2b   : > { %2085 = vmatmul.mubr.msk.f32.gmra.mxu0 %vm325_vm1, %v374_v58  ;;  %v380_v6 = vld [vmem:[#allocation2 + $0x68] sm:$0xff]  ;;  %v381_v7 = vld [vmem:[#allocation2 + $0x70] sm:$0xff] }
  0x2c   : > { %2087 = vmatprep.mubr.msk.f32.mxu0 %vm325_vm1, %v375_v59  ;;  %v382_v9 = vld [vmem:[#allocation2 + $0x78] sm:$0xff]  ;;  %v790_v10 = vld [vmem:[#allocation2 + $0x100] sm:$0xff] }
  0x2d   : > { %2112 = vmatmul.mubr.msk.f32.gmra.mxu1 %vm325_vm1, %v2495_v60  ;;  %v1246_v11 = vld [vmem:[#allocation2 + $0x110] sm:$0xff]  ;;  %v791_v12 = vld [vmem:[#allocation2 + $0x108] sm:$0xff] }
  0x2e   : > { %2114 = vmatprep.mubr.msk.f32.mxu1 %vm325_vm1, %v2497_v61  ;;  %v1247_v13 = vld [vmem:[#allocation2 + $0x118] sm:$0xff] }
  0x2f   : > { %2088 = vmatmul.mubr.msk.f32.gmra.mxu0 %vm325_vm1, %v376_v62 }
  0x30   : > { %2090 = vmatprep.mubr.msk.f32.mxu0 %vm325_vm1, %v377_v63 }
  0x31   : > { %2115 = vmatmul.mubr.msk.f32.gmra.mxu1 %vm325_vm1, %v2505_v0 }
  0x32   : > { %2117 = vmatprep.mubr.msk.f32.mxu1 %vm325_vm1, %v2507_v1 }
  0x33   : > { %2091 = vmatmul.mubr.msk.f32.gmra.mxu0 %vm325_vm1, %v378_v2 }
  0x34   : > { %2093 = vmatprep.mubr.msk.f32.mxu0 %vm325_vm1, %v379_v3 }
  0x35   : > { %2118 = vmatmul.mubr.msk.f32.gmra.mxu1 %vm325_vm1, %v2515_v4 }
  0x36   : > { %2120 = vmatprep.mubr.msk.f32.mxu1 %vm325_vm1, %v2517_v5 }
  0x37   : > { %2094 = vmatmul.mubr.msk.f32.gmra.mxu0 %vm325_vm1, %v380_v6 }
  0x38   : > { %2096 = vmatprep.mubr.msk.f32.mxu0 %vm325_vm1, %v381_v7 }
  0x39   : > { %2121 = vmatmul.mubr.msk.f32.gmra.mxu1 %vm325_vm1, %v2525_v8 }
  0x3a   : > { %2127 = vmatprep.mubr.msk.f32.mxu1 %vm325_vm1, %v2416_v34 }
  0x3b   : > { %2097 = vmatmul.mubr.msk.f32.gmra.mxu0 %vm325_vm1, %v382_v9 }
  0x3c   : > { %2179 = vmatprep.mubr.msk.f32.mxu0 %vm325_vm1, %v2440_v39 }
  0x3d   : > { %2128 = vmatmul.mubr.msk.f32.vlgmr.msra.gmra.mxu1 %vm325_vm1, %v2436_v38 }
  0x3e   : > { %2130 = vmatprep.mubr.msk.f32.mxu1 %vm325_vm1, %v2440_v39 }
  0x3f   : > { %2180 = vmatmul.mubr.msk.f32.vlgmr.msra.gmra.mxu0 %vm325_vm1, %v2448_v42 }
  0x40   : > { %2182 = vmatprep.mubr.msk.f32.mxu0 %vm325_vm1, %v2455_v43 }
  0x41   : > { %2131 = vmatmul.mubr.msk.f32.gmra.mxu1 %vm325_vm1, %v2448_v42 }
  0x42   : > { %2133 = vmatprep.mubr.msk.f32.mxu1 %vm325_vm1, %v2455_v43 }
  0x43   : > { %2183 = vmatmul.mubr.msk.f32.gmra.mxu0 %vm325_vm1, %v374_v58 }
  0x44   : > { %2185 = vmatprep.mubr.msk.f32.mxu0 %vm325_vm1, %v375_v59 }
  0x45   : > { %2134 = vmatmul.mubr.msk.f32.gmra.mxu1 %vm325_vm1, %v374_v58 }
  0x46   : > { %2136 = vmatprep.mubr.msk.f32.mxu1 %vm325_vm1, %v375_v59 }
  0x47   : > { %2186 = vmatmul.mubr.msk.f32.gmra.mxu0 %vm325_vm1, %v376_v62 }
  0x48   : > { %2188 = vmatprep.mubr.msk.f32.mxu0 %vm325_vm1, %v377_v63 }
  0x49   : > { %2137 = vmatmul.mubr.msk.f32.gmra.mxu1 %vm325_vm1, %v376_v62 }
  0x4a   : > { %2139 = vmatprep.mubr.msk.f32.mxu1 %vm325_vm1, %v377_v63 }
  0x4b   : > { %2189 = vmatmul.mubr.msk.f32.gmra.mxu0 %vm325_vm1, %v378_v2 }
  0x4c   : > { %2191 = vmatprep.mubr.msk.f32.mxu0 %vm325_vm1, %v379_v3 }
  0x4d   : > { %2140 = vmatmul.mubr.msk.f32.gmra.mxu1 %vm325_vm1, %v378_v2 }
  0x4e   : > { %2142 = vmatprep.mubr.msk.f32.mxu1 %vm325_vm1, %v379_v3 }
  0x4f   : > { %2192 = vmatmul.mubr.msk.f32.gmra.mxu0 %vm325_vm1, %v380_v6 }
  0x50   : > { %2194 = vmatprep.mubr.msk.f32.mxu0 %vm325_vm1, %v381_v7 }
  0x51   : > { %2143 = vmatmul.mubr.msk.f32.gmra.mxu1 %vm325_vm1, %v380_v6 }
  0x52   : > { %2145 = vmatprep.mubr.msk.f32.mxu1 %vm325_vm1, %v381_v7 }
  0x53   : > { %2195 = vmatmul.mubr.msk.f32.gmra.mxu0 %vm325_vm1, %v382_v9 }
  0x54   : > { %2197 = vmatprep.mubr.msk.f32.mxu0 %vm325_vm1, %v2399_v28 }
  0x55   : > { %2146 = vmatmul.mubr.msk.f32.gmra.mxu1 %vm325_vm1, %v382_v9 }
  0x56   : > { %2148 = vmatprep.mubr.msk.f32.mxu1 %vm325_vm1, %v2399_v28 }
  0x57   : > { %2198 = vmatmul.mubr.msk.f32.gmra.mxu0 %vm325_vm1, %v2401_v29 }
  0x58   : > { %2200 = vmatprep.mubr.msk.f32.mxu0 %vm325_vm1, %v2403_v30 }
  0x59   : > { %2149 = vmatmul.mubr.msk.f32.gmra.mxu1 %vm325_vm1, %v2401_v29 }
  0x5a   : > { %2151 = vmatprep.mubr.msk.f32.mxu1 %vm325_vm1, %v2403_v30 }
  0x5b   : > { %2201 = vmatmul.mubr.msk.f32.gmra.mxu0 %vm325_vm1, %v2422_v35 }
  0x5c   : > { %2203 = vmatprep.mubr.msk.f32.mxu0 %vm325_vm1, %v2427_v37 }
  0x5d   : > { %2152 = vmatmul.mubr.msk.f32.gmra.mxu1 %vm325_vm1, %v2422_v35 }
  0x5e   : > { %2154 = vmatprep.mubr.msk.f32.mxu1 %vm325_vm1, %v2427_v37 }
  0x5f   : > { %2204 = vmatmul.mubr.msk.f32.gmra.mxu0 %vm325_vm1, %v2444_v40 }
  0x60   : > { %2206 = vmatprep.mubr.msk.f32.mxu0 %vm325_vm1, %v2446_v41 }
  0x61   : > { %2155 = vmatmul.mubr.msk.f32.gmra.mxu1 %vm325_vm1, %v2444_v40 }
  0x62   : > { %2157 = vmatprep.mubr.msk.f32.mxu1 %vm325_vm1, %v2446_v41 }
  0x63   : > { %2207 = vmatmul.mubr.msk.f32.gmra.mxu0 %vm325_vm1, %v2460_v47 }
  0x64   : > { %2209 = vmatprep.mubr.msk.f32.mxu0 %vm325_vm1, %v2482_v57 }
  0x65   : > { %2158 = vmatmul.mubr.msk.f32.gmra.mxu1 %vm325_vm1, %v2460_v47 }
  0x66   : > { %2160 = vmatprep.mubr.msk.f32.mxu1 %vm325_vm1, %v2482_v57 }
  0x67   : > { %2210 = vmatmul.mubr.msk.f32.gmra.mxu0 %vm325_vm1, %v2495_v60 }
  0x68   : > { %2212 = vmatprep.mubr.msk.f32.mxu0 %vm325_vm1, %v2497_v61 }
  0x69   : > { %2161 = vmatmul.mubr.msk.f32.gmra.mxu1 %vm325_vm1, %v2495_v60 }
  0x6a   : > { %2163 = vmatprep.mubr.msk.f32.mxu1 %vm325_vm1, %v2497_v61 }
  0x6b   : > { %2213 = vmatmul.mubr.msk.f32.gmra.mxu0 %vm325_vm1, %v2505_v0 }
  0x6c   : > { %2215 = vmatprep.mubr.msk.f32.mxu0 %vm325_vm1, %v2507_v1 }
  0x6d   : > { %2164 = vmatmul.mubr.msk.f32.gmra.mxu1 %vm325_vm1, %v2505_v0 }
  0x6e   : > { %2166 = vmatprep.mubr.msk.f32.mxu1 %vm325_vm1, %v2507_v1 }
  0x6f   : > { %2216 = vmatmul.mubr.msk.f32.gmra.mxu0 %vm325_vm1, %v2515_v4 }
  0x70   : > { %2218 = vmatprep.mubr.msk.f32.mxu0 %vm325_vm1, %v2517_v5 }
  0x71   : > { %2167 = vmatmul.mubr.msk.f32.gmra.mxu1 %vm325_vm1, %v2515_v4 }
  0x72   : > { %2169 = vmatprep.mubr.msk.f32.mxu1 %vm325_vm1, %v2517_v5 }
  0x73   : > { %2219 = vmatmul.mubr.msk.f32.gmra.mxu0 %vm325_vm1, %v2525_v8 }
  0x74   : > { %2221 = vmatprep.mubr.msk.f32.mxu0 %vm325_vm1, %v790_v10 }
  0x75   : > { %2170 = vmatmul.mubr.msk.f32.gmra.mxu1 %vm325_vm1, %v2525_v8 }
  0x76   : > { %2172 = vmatprep.mubr.msk.f32.mxu1 %vm325_vm1, %v790_v10 }
  0x77   : > { %2222 = vmatmul.mubr.msk.f32.gmra.mxu0 %vm325_vm1, %v791_v12 }
  0x78   : > { %2224 = vmatprep.mubr.msk.f32.mxu0 %vm325_vm1, %v1246_v11 }
  0x79   : > { %2173 = vmatmul.mubr.msk.f32.gmra.mxu1 %vm325_vm1, %v791_v12 }
  0x7b   : > { %2225 = vmatmul.mubr.msk.f32.gmra.mxu0 %vm325_vm1, %v1247_v13 }
  0xdd   : > { %v2101_v14 = vpop.f32.mrf.mxu1 }
  0xde   : > { %744 = vst.msk [vmem:[#allocation3 + $0x88] sm:$0xff] %vm726_vm2, %v2101_v14 }
  0xdf   : > { %v647_v15 = vpop.f32.mrf.mxu1  ;;  %v2077_v16 = vpop.f32.mrf.mxu0 }
  0xe0   : > { %743 = vst.msk [vmem:[#allocation3 + $0x80] sm:$0xff] %vm726_vm2, %v647_v15  ;;  %728 = vst.msk [vmem:[#allocation3 + $0x8] sm:$0xff] %vm726_vm2, %v2077_v16 }
  0xe1   : > { %v2104_v17 = vpop.f32.mrf.mxu1  ;;  %v567_v18 = vpop.f32.mrf.mxu0 }
  0xe2   : > { %746 = vst.msk [vmem:[#allocation3 + $0x98] sm:$0xff] %vm726_vm2, %v2104_v17  ;;  %727 = vst.msk [vmem:[#allocation3] sm:$0xff] %vm726_vm2, %v567_v18 }
  0xe3   : > { %v657_v19 = vpop.f32.mrf.mxu1  ;;  %v2080_v20 = vpop.f32.mrf.mxu0 }
  0xe4   : > { %745 = vst.msk [vmem:[#allocation3 + $0x90] sm:$0xff] %vm726_vm2, %v657_v19  ;;  %730 = vst.msk [vmem:[#allocation3 + $0x18] sm:$0xff] %vm726_vm2, %v2080_v20 }
  0xe5   : > { %v2107_v21 = vpop.f32.mrf.mxu1  ;;  %v577_v22 = vpop.f32.mrf.mxu0 }
  0xe6   : > { %748 = vst.msk [vmem:[#allocation3 + $0xa8] sm:$0xff] %vm726_vm2, %v2107_v21  ;;  %729 = vst.msk [vmem:[#allocation3 + $0x10] sm:$0xff] %vm726_vm2, %v577_v22 }
  0xe7   : > { %v667_v23 = vpop.f32.mrf.mxu1  ;;  %v2083_v24 = vpop.f32.mrf.mxu0  ;;  %v1120_v46 = vld [vmem:[#allocation3 + $0x8] sm:$0xff] }
  0xe8   : > { %747 = vst.msk [vmem:[#allocation3 + $0xa0] sm:$0xff] %vm726_vm2, %v667_v23  ;;  %732 = vst.msk [vmem:[#allocation3 + $0x28] sm:$0xff] %vm726_vm2, %v2083_v24 }
  0xe9   : > { %v2110_v25 = vpop.f32.mrf.mxu1  ;;  %v587_v26 = vpop.f32.mrf.mxu0  ;;  %v1119_v50 = vld [vmem:[#allocation3] sm:$0xff] }
  0xea   : > { %750 = vst.msk [vmem:[#allocation3 + $0xb8] sm:$0xff] %vm726_vm2, %v2110_v25  ;;  %731 = vst.msk [vmem:[#allocation3 + $0x20] sm:$0xff] %vm726_vm2, %v587_v26 }
  0xeb   : > { %v677_v27 = vpop.f32.mrf.mxu1  ;;  %v2086_v28 = vpop.f32.mrf.mxu0  ;;  %v1122_v54 = vld [vmem:[#allocation3 + $0x18] sm:$0xff] }
  0xec   : > { %749 = vst.msk [vmem:[#allocation3 + $0xb0] sm:$0xff] %vm726_vm2, %v677_v27  ;;  %734 = vst.msk [vmem:[#allocation3 + $0x38] sm:$0xff] %vm726_vm2, %v2086_v28 }
  0xed   : > { %v2113_v29 = vpop.f32.mrf.mxu1  ;;  %v597_v30 = vpop.f32.mrf.mxu0  ;;  %v1121_v58 = vld [vmem:[#allocation3 + $0x10] sm:$0xff] }
  0xee   : > { %752 = vst.msk [vmem:[#allocation3 + $0xc8] sm:$0xff] %vm726_vm2, %v2113_v29  ;;  %733 = vst.msk [vmem:[#allocation3 + $0x30] sm:$0xff] %vm726_vm2, %v597_v30 }
  0xef   : > { %v687_v31 = vpop.f32.mrf.mxu1  ;;  %v2089_v32 = vpop.f32.mrf.mxu0  ;;  %v1124_v62 = vld [vmem:[#allocation3 + $0x28] sm:$0xff] }
  0xf0   : > { %751 = vst.msk [vmem:[#allocation3 + $0xc0] sm:$0xff] %vm726_vm2, %v687_v31  ;;  %736 = vst.msk [vmem:[#allocation3 + $0x48] sm:$0xff] %vm726_vm2, %v2089_v32 }
  0xf1   : > { %v2116_v33 = vpop.f32.mrf.mxu1  ;;  %v607_v34 = vpop.f32.mrf.mxu0  ;;  %v1123_v3 = vld [vmem:[#allocation3 + $0x20] sm:$0xff] }
  0xf2   : > { %754 = vst.msk [vmem:[#allocation3 + $0xd8] sm:$0xff] %vm726_vm2, %v2116_v33  ;;  %735 = vst.msk [vmem:[#allocation3 + $0x40] sm:$0xff] %vm726_vm2, %v607_v34 }
  0xf3   : > { %v697_v35 = vpop.f32.mrf.mxu1  ;;  %v2092_v36 = vpop.f32.mrf.mxu0  ;;  %v1126_v9 = vld [vmem:[#allocation3 + $0x38] sm:$0xff] }
  0xf4   : > { %753 = vst.msk [vmem:[#allocation3 + $0xd0] sm:$0xff] %vm726_vm2, %v697_v35  ;;  %738 = vst.msk [vmem:[#allocation3 + $0x58] sm:$0xff] %vm726_vm2, %v2092_v36 }
  0xf5   : > { %v2119_v37 = vpop.f32.mrf.mxu1  ;;  %v617_v38 = vpop.f32.mrf.mxu0  ;;  %v1125_v15 = vld [vmem:[#allocation3 + $0x30] sm:$0xff] }
  0xf6   : > { %756 = vst.msk [vmem:[#allocation3 + $0xe8] sm:$0xff] %vm726_vm2, %v2119_v37  ;;  %737 = vst.msk [vmem:[#allocation3 + $0x50] sm:$0xff] %vm726_vm2, %v617_v38 }
  0xf7   : > { %v707_v39 = vpop.f32.mrf.mxu1  ;;  %v2095_v40 = vpop.f32.mrf.mxu0  ;;  %v1128_v21 = vld [vmem:[#allocation3 + $0x48] sm:$0xff] }
  0xf8   : > { %755 = vst.msk [vmem:[#allocation3 + $0xe0] sm:$0xff] %vm726_vm2, %v707_v39  ;;  %740 = vst.msk [vmem:[#allocation3 + $0x68] sm:$0xff] %vm726_vm2, %v2095_v40 }
  0xf9   : > { %v2122_v41 = vpop.f32.mrf.mxu1  ;;  %v627_v42 = vpop.f32.mrf.mxu0  ;;  %v1127_v27 = vld [vmem:[#allocation3 + $0x40] sm:$0xff] }
  0xfa   : > { %758 = vst.msk [vmem:[#allocation3 + $0xf8] sm:$0xff] %vm726_vm2, %v2122_v41  ;;  %739 = vst.msk [vmem:[#allocation3 + $0x60] sm:$0xff] %vm726_vm2, %v627_v42 }
  0xfb   : > { %v717_v43 = vpop.f32.mrf.mxu1  ;;  %v2098_v44 = vpop.f32.mrf.mxu0  ;;  %v1130_v34 = vld [vmem:[#allocation3 + $0x58] sm:$0xff] }
  0xfc   : > { %757 = vst.msk [vmem:[#allocation3 + $0xf0] sm:$0xff] %vm726_vm2, %v717_v43  ;;  %742 = vst.msk [vmem:[#allocation3 + $0x78] sm:$0xff] %vm726_vm2, %v2098_v44 }
  0xfd   : > { %v2129_v45 = vpop.f32.mrf.mxu1  ;;  %v637_v47 = vpop.f32.mrf.mxu0  ;;  %v1129_v41 = vld [vmem:[#allocation3 + $0x50] sm:$0xff] }
  0xfe   : > { %v1152_v48 = vadd.f32 %v2129_v45, %v1120_v46  ;;  %741 = vst.msk [vmem:[#allocation3 + $0x70] sm:$0xff] %vm726_vm2, %v637_v47 }
  0xff   : > { %v960_v49 = vpop.f32.mrf.mxu1  ;;  %v2181_v51 = vpop.f32.mrf.mxu0 }
 0x100   : > { %1184 = vst.msk [vmem:[#allocation3 + $0x8] sm:$0xff] %vm726_vm2, %v1152_v48  ;;  %v1151_v52 = vadd.f32 %v1119_v50, %v960_v49  ;;  %v1132_v48 = vld [vmem:[#allocation3 + $0x68] sm:$0xff] }
 0x101   : > { %v2132_v53 = vpop.f32.mrf.mxu1  ;;  %v1416_v55 = vpop.f32.mrf.mxu0 }
 0x102   : > { %1183 = vst.msk [vmem:[#allocation3] sm:$0xff] %vm726_vm2, %v1151_v52  ;;  %v1154_v56 = vadd.f32 %v2132_v53, %v1122_v54 }
 0x103   : > { %v970_v57 = vpop.f32.mrf.mxu1  ;;  %v2184_v59 = vpop.f32.mrf.mxu0 }
 0x104   : > { %1186 = vst.msk [vmem:[#allocation3 + $0x18] sm:$0xff] %vm726_vm2, %v1154_v56  ;;  %v1153_v60 = vadd.f32 %v1121_v58, %v970_v57 }
 0x105   : > { %v2135_v61 = vpop.f32.mrf.mxu1  ;;  %v1426_v63 = vpop.f32.mrf.mxu0 }
 0x106   : > { %1185 = vst.msk [vmem:[#allocation3 + $0x10] sm:$0xff] %vm726_vm2, %v1153_v60  ;;  %v1156_v0 = vadd.f32 %v2135_v61, %v1124_v62  ;;  %v1134_v62 = vld [vmem:[#allocation3 + $0x78] sm:$0xff] }
 0x107   : > { %v1576_v1 = vld [vmem:[#allocation3 + $0x8] sm:$0xff]  ;;  %v980_v2 = vpop.f32.mrf.mxu1  ;;  %v2187_v4 = vpop.f32.mrf.mxu0 }
 0x108   : > { %1188 = vst.msk [vmem:[#allocation3 + $0x28] sm:$0xff] %vm726_vm2, %v1156_v0  ;;  %v1608_v5 = vadd.f32 %v2181_v51, %v1576_v1  ;;  %v1155_v6 = vadd.f32 %v1123_v3, %v980_v2 }
 0x109   : > { %v1575_v7 = vld [vmem:[#allocation3] sm:$0xff]  ;;  %v2138_v8 = vpop.f32.mrf.mxu1  ;;  %v1436_v10 = vpop.f32.mrf.mxu0 }
 0x10a   : > { %1640 = vst.msk [vmem:[#allocation3 + $0x8] sm:$0xff] %vm726_vm2, %v1608_v5  ;;  %1187 = vst.msk [vmem:[#allocation3 + $0x20] sm:$0xff] %vm726_vm2, %v1155_v6  ;;  %v1607_v11 = vadd.f32 %v1575_v7, %v1416_v55  ;;  %v1158_v12 = vadd.f32 %v2138_v8, %v1126_v9  ;;  %v1131_v55 = vld [vmem:[#allocation3 + $0x60] sm:$0xff]  ;;  %v1133_v5 = vld [vmem:[#allocation3 + $0x70] sm:$0xff] }
 0x10b   : > { %v1578_v13 = vld [vmem:[#allocation3 + $0x18] sm:$0xff]  ;;  %v990_v14 = vpop.f32.mrf.mxu1  ;;  %v2190_v16 = vpop.f32.mrf.mxu0 }
 0x10c   : > { %1639 = vst.msk [vmem:[#allocation3] sm:$0xff] %vm726_vm2, %v1607_v11  ;;  %1190 = vst.msk [vmem:[#allocation3 + $0x38] sm:$0xff] %vm726_vm2, %v1158_v12  ;;  %v1610_v17 = vadd.f32 %v2184_v59, %v1578_v13  ;;  %v1157_v18 = vadd.f32 %v1125_v15, %v990_v14  ;;  %v1136_v12 = vld [vmem:[#allocation3 + $0x88] sm:$0xff] }
 0x10d   : > { %v1577_v19 = vld [vmem:[#allocation3 + $0x10] sm:$0xff]  ;;  %v2141_v20 = vpop.f32.mrf.mxu1  ;;  %v1446_v22 = vpop.f32.mrf.mxu0 }
 0x10e   : > { %1642 = vst.msk [vmem:[#allocation3 + $0x18] sm:$0xff] %vm726_vm2, %v1610_v17  ;;  %1189 = vst.msk [vmem:[#allocation3 + $0x30] sm:$0xff] %vm726_vm2, %v1157_v18  ;;  %v1609_v23 = vadd.f32 %v1577_v19, %v1426_v63  ;;  %v1160_v24 = vadd.f32 %v2141_v20, %v1128_v21  ;;  %v1135_v19 = vld [vmem:[#allocation3 + $0x80] sm:$0xff] }
 0x10f   : > { %v1580_v25 = vld [vmem:[#allocation3 + $0x28] sm:$0xff]  ;;  %v1000_v26 = vpop.f32.mrf.mxu1  ;;  %v2193_v28 = vpop.f32.mrf.mxu0 }
 0x110   : > { %1641 = vst.msk [vmem:[#allocation3 + $0x10] sm:$0xff] %vm726_vm2, %v1609_v23  ;;  %1192 = vst.msk [vmem:[#allocation3 + $0x48] sm:$0xff] %vm726_vm2, %v1160_v24  ;;  %v1612_v29 = vadd.f32 %v2187_v4, %v1580_v25  ;;  %v1159_v30 = vadd.f32 %v1127_v27, %v1000_v26  ;;  %v1138_v26 = vld [vmem:[#allocation3 + $0x98] sm:$0xff] }
 0x111   : > { %v1672_v31 = vld [vmem:[#allocation3 + $0x8] sm:$0xff]  ;;  %v1579_v32 = vld [vmem:[#allocation3 + $0x20] sm:$0xff]  ;;  %v2144_v33 = vpop.f32.mrf.mxu1  ;;  %v1456_v35 = vpop.f32.mrf.mxu0 }
 0x112   : > { %1704 = vst.msk [vmem:[%s2683_s12 + $0x8] sm:$0xff] %vm726_vm2, %v1672_v31  ;;  %1644 = vst.msk [vmem:[#allocation3 + $0x28] sm:$0xff] %vm726_vm2, %v1612_v29  ;;  %v1611_v36 = vadd.f32 %v1579_v32, %v1436_v10  ;;  %v1162_v37 = vadd.f32 %v2144_v33, %v1130_v34  ;;  %v1137_v33 = vld [vmem:[#allocation3 + $0x90] sm:$0xff] }
 0x113   : > { %1191 = vst.msk [vmem:[#allocation3 + $0x40] sm:$0xff] %vm726_vm2, %v1159_v30  ;;  %v1671_v38 = vld [vmem:[#allocation3] sm:$0xff]  ;;  %v1582_v39 = vld [vmem:[#allocation3 + $0x38] sm:$0xff]  ;;  %v1010_v40 = vpop.f32.mrf.mxu1  ;;  %v2196_v42 = vpop.f32.mrf.mxu0 }
 0x114   : > { %1703 = vst.msk [vmem:[%s2683_s12] sm:$0xff] %vm726_vm2, %v1671_v38  ;;  %1643 = vst.msk [vmem:[#allocation3 + $0x20] sm:$0xff] %vm726_vm2, %v1611_v36  ;;  %v1614_v43 = vadd.f32 %v2190_v16, %v1582_v39  ;;  %v1161_v44 = vadd.f32 %v1129_v41, %v1010_v40  ;;  %v1140_v40 = vld [vmem:[#allocation3 + $0xa8] sm:$0xff] }
 0x115   : > { %1194 = vst.msk [vmem:[#allocation3 + $0x58] sm:$0xff] %vm726_vm2, %v1162_v37  ;;  %v1674_v45 = vld [vmem:[#allocation3 + $0x18] sm:$0xff]  ;;  %v1581_v46 = vld [vmem:[#allocation3 + $0x30] sm:$0xff]  ;;  %v2147_v47 = vpop.f32.mrf.mxu1  ;;  %v1466_v49 = vpop.f32.mrf.mxu0 }
 0x116   : > { %1706 = vst.msk [vmem:[%s2683_s12 + $0x18] sm:$0xff] %vm726_vm2, %v1674_v45  ;;  %1646 = vst.msk [vmem:[#allocation3 + $0x38] sm:$0xff] %vm726_vm2, %v1614_v43  ;;  %v1613_v50 = vadd.f32 %v1581_v46, %v1446_v22  ;;  %v1164_v51 = vadd.f32 %v2147_v47, %v1132_v48  ;;  %v1139_v47 = vld [vmem:[#allocation3 + $0xa0] sm:$0xff] }
 0x117   : > { %1193 = vst.msk [vmem:[#allocation3 + $0x50] sm:$0xff] %vm726_vm2, %v1161_v44  ;;  %v1673_v52 = vld [vmem:[#allocation3 + $0x10] sm:$0xff]  ;;  %v1584_v53 = vld [vmem:[#allocation3 + $0x48] sm:$0xff]  ;;  %v1020_v54 = vpop.f32.mrf.mxu1  ;;  %v2199_v56 = vpop.f32.mrf.mxu0 }
 0x118   : > { %1705 = vst.msk [vmem:[%s2683_s12 + $0x10] sm:$0xff] %vm726_vm2, %v1673_v52  ;;  %1645 = vst.msk [vmem:[#allocation3 + $0x30] sm:$0xff] %vm726_vm2, %v1613_v50  ;;  %v1616_v57 = vadd.f32 %v2193_v28, %v1584_v53  ;;  %v1163_v58 = vadd.f32 %v1131_v55, %v1020_v54  ;;  %v1142_v54 = vld [vmem:[#allocation3 + $0xb8] sm:$0xff] }
 0x119   : > { %1196 = vst.msk [vmem:[#allocation3 + $0x68] sm:$0xff] %vm726_vm2, %v1164_v51  ;;  %v1676_v59 = vld [vmem:[#allocation3 + $0x28] sm:$0xff]  ;;  %v2150_v61 = vpop.f32.mrf.mxu1  ;;  %v1476_v63 = vpop.f32.mrf.mxu0 }
 0x11a   : > { %v1583_v60 = vld [vmem:[#allocation3 + $0x40] sm:$0xff]  ;;  %1708 = vst.msk [vmem:[%s2683_s12 + $0x28] sm:$0xff] %vm726_vm2, %v1676_v59  ;;  %1648 = vst.msk [vmem:[#allocation3 + $0x48] sm:$0xff] %vm726_vm2, %v1616_v57  ;;  %v1166_v1 = vadd.f32 %v2150_v61, %v1134_v62  ;;  %v1141_v61 = vld [vmem:[#allocation3 + $0xb0] sm:$0xff] }
 0x11b   : > { %1195 = vst.msk [vmem:[#allocation3 + $0x60] sm:$0xff] %vm726_vm2, %v1163_v58  ;;  %v1615_v0 = vadd.f32 %v1583_v60, %v1456_v35  ;;  %v1675_v2 = vld [vmem:[#allocation3 + $0x20] sm:$0xff]  ;;  %v1030_v4 = vpop.f32.mrf.mxu1  ;;  %v2202_v6 = vpop.f32.mrf.mxu0 }
 0x11c   : > { %v1586_v3 = vld [vmem:[#allocation3 + $0x58] sm:$0xff]  ;;  %1707 = vst.msk [vmem:[%s2683_s12 + $0x20] sm:$0xff] %vm726_vm2, %v1675_v2  ;;  %1198 = vst.msk [vmem:[#allocation3 + $0x78] sm:$0xff] %vm726_vm2, %v1166_v1  ;;  %v1165_v8 = vadd.f32 %v1133_v5, %v1030_v4  ;;  %v1144_v4 = vld [vmem:[#allocation3 + $0xc8] sm:$0xff] }
 0x11d   : > { %1647 = vst.msk [vmem:[#allocation3 + $0x40] sm:$0xff] %vm726_vm2, %v1615_v0  ;;  %v1618_v7 = vadd.f32 %v2196_v42, %v1586_v3  ;;  %v1678_v9 = vld [vmem:[#allocation3 + $0x38] sm:$0xff]  ;;  %v2153_v11 = vpop.f32.mrf.mxu1  ;;  %v1486_v13 = vpop.f32.mrf.mxu0 }
 0x11e   : > { %v1585_v10 = vld [vmem:[#allocation3 + $0x50] sm:$0xff]  ;;  %1710 = vst.msk [vmem:[%s2683_s12 + $0x38] sm:$0xff] %vm726_vm2, %v1678_v9  ;;  %1197 = vst.msk [vmem:[#allocation3 + $0x70] sm:$0xff] %vm726_vm2, %v1165_v8  ;;  %v1168_v15 = vadd.f32 %v2153_v11, %v1136_v12  ;;  %v1143_v11 = vld [vmem:[#allocation3 + $0xc0] sm:$0xff] }
 0x11f   : > { %1650 = vst.msk [vmem:[#allocation3 + $0x58] sm:$0xff] %vm726_vm2, %v1618_v7  ;;  %v1617_v14 = vadd.f32 %v1585_v10, %v1466_v49  ;;  %v1677_v16 = vld [vmem:[#allocation3 + $0x30] sm:$0xff]  ;;  %v1040_v18 = vpop.f32.mrf.mxu1  ;;  %v2205_v20 = vpop.f32.mrf.mxu0 }
 0x120   : > { %v1588_v17 = vld [vmem:[#allocation3 + $0x68] sm:$0xff]  ;;  %1709 = vst.msk [vmem:[%s2683_s12 + $0x30] sm:$0xff] %vm726_vm2, %v1677_v16  ;;  %1200 = vst.msk [vmem:[#allocation3 + $0x88] sm:$0xff] %vm726_vm2, %v1168_v15  ;;  %v1167_v22 = vadd.f32 %v1135_v19, %v1040_v18  ;;  %v1146_v18 = vld [vmem:[#allocation3 + $0xd8] sm:$0xff] }
 0x121   : > { %1649 = vst.msk [vmem:[#allocation3 + $0x50] sm:$0xff] %vm726_vm2, %v1617_v14  ;;  %v1620_v21 = vadd.f32 %v2199_v56, %v1588_v17  ;;  %v1680_v23 = vld [vmem:[#allocation3 + $0x48] sm:$0xff]  ;;  %v2156_v25 = vpop.f32.mrf.mxu1  ;;  %v1496_v27 = vpop.f32.mrf.mxu0 }
 0x122   : > { %v1587_v24 = vld [vmem:[#allocation3 + $0x60] sm:$0xff]  ;;  %1712 = vst.msk [vmem:[%s2683_s12 + $0x48] sm:$0xff] %vm726_vm2, %v1680_v23  ;;  %1199 = vst.msk [vmem:[#allocation3 + $0x80] sm:$0xff] %vm726_vm2, %v1167_v22  ;;  %v1170_v29 = vadd.f32 %v2156_v25, %v1138_v26  ;;  %v1145_v25 = vld [vmem:[#allocation3 + $0xd0] sm:$0xff] }
 0x123   : > { %1652 = vst.msk [vmem:[#allocation3 + $0x68] sm:$0xff] %vm726_vm2, %v1620_v21  ;;  %v1619_v28 = vadd.f32 %v1587_v24, %v1476_v63  ;;  %v1590_v31 = vld [vmem:[#allocation3 + $0x78] sm:$0xff]  ;;  %v1050_v32 = vpop.f32.mrf.mxu1  ;;  %v2208_v34 = vpop.f32.mrf.mxu0 }
 0x124   : > { %v1679_v30 = vld [vmem:[#allocation3 + $0x40] sm:$0xff]  ;;  %1202 = vst.msk [vmem:[#allocation3 + $0x98] sm:$0xff] %vm726_vm2, %v1170_v29  ;;  %v1622_v35 = vadd.f32 %v2202_v6, %v1590_v31  ;;  %v1169_v36 = vadd.f32 %v1137_v33, %v1050_v32  ;;  %v1148_v32 = vld [vmem:[#allocation3 + $0xe8] sm:$0xff] }
 0x125   : > { %1711 = vst.msk [vmem:[%s2683_s12 + $0x40] sm:$0xff] %vm726_vm2, %v1679_v30  ;;  %1651 = vst.msk [vmem:[#allocation3 + $0x60] sm:$0xff] %vm726_vm2, %v1619_v28  ;;  %v1589_v38 = vld [vmem:[#allocation3 + $0x70] sm:$0xff]  ;;  %v2159_v39 = vpop.f32.mrf.mxu1  ;;  %v1506_v41 = vpop.f32.mrf.mxu0 }
 0x126   : > { %v1682_v37 = vld [vmem:[#allocation3 + $0x58] sm:$0xff]  ;;  %1654 = vst.msk [vmem:[#allocation3 + $0x78] sm:$0xff] %vm726_vm2, %v1622_v35  ;;  %1201 = vst.msk [vmem:[#allocation3 + $0x90] sm:$0xff] %vm726_vm2, %v1169_v36  ;;  %v1621_v42 = vadd.f32 %v1589_v38, %v1486_v13  ;;  %v1172_v43 = vadd.f32 %v2159_v39, %v1140_v40  ;;  %v1147_v39 = vld [vmem:[#allocation3 + $0xe0] sm:$0xff] }
 0x127   : > { %1714 = vst.msk [vmem:[%s2683_s12 + $0x58] sm:$0xff] %vm726_vm2, %v1682_v37  ;;  %v1592_v45 = vld [vmem:[#allocation3 + $0x88] sm:$0xff]  ;;  %v1060_v46 = vpop.f32.mrf.mxu1  ;;  %v2211_v48 = vpop.f32.mrf.mxu0 }
 0x128   : > { %v1681_v44 = vld [vmem:[#allocation3 + $0x50] sm:$0xff]  ;;  %1653 = vst.msk [vmem:[#allocation3 + $0x70] sm:$0xff] %vm726_vm2, %v1621_v42  ;;  %1204 = vst.msk [vmem:[#allocation3 + $0xa8] sm:$0xff] %vm726_vm2, %v1172_v43  ;;  %v1624_v49 = vadd.f32 %v2205_v20, %v1592_v45  ;;  %v1171_v50 = vadd.f32 %v1139_v47, %v1060_v46  ;;  %v1150_v45 = vld [vmem:[#allocation3 + $0xf8] sm:$0xff] }
 0x129   : > { %1713 = vst.msk [vmem:[%s2683_s12 + $0x50] sm:$0xff] %vm726_vm2, %v1681_v44  ;;  %v1591_v52 = vld [vmem:[#allocation3 + $0x80] sm:$0xff]  ;;  %v2162_v53 = vpop.f32.mrf.mxu1  ;;  %v1516_v55 = vpop.f32.mrf.mxu0 }
 0x12a   : > { %v1684_v51 = vld [vmem:[#allocation3 + $0x68] sm:$0xff]  ;;  %1656 = vst.msk [vmem:[#allocation3 + $0x88] sm:$0xff] %vm726_vm2, %v1624_v49  ;;  %1203 = vst.msk [vmem:[#allocation3 + $0xa0] sm:$0xff] %vm726_vm2, %v1171_v50  ;;  %v1623_v56 = vadd.f32 %v1591_v52, %v1496_v27  ;;  %v1174_v57 = vadd.f32 %v2162_v53, %v1142_v54  ;;  %v1149_v52 = vld [vmem:[#allocation3 + $0xf0] sm:$0xff] }
 0x12b   : > { %1716 = vst.msk [vmem:[%s2683_s12 + $0x68] sm:$0xff] %vm726_vm2, %v1684_v51  ;;  %v1594_v59 = vld [vmem:[#allocation3 + $0x98] sm:$0xff]  ;;  %v1070_v60 = vpop.f32.mrf.mxu1  ;;  %v2214_v62 = vpop.f32.mrf.mxu0 }
 0x12c   : > { %v1683_v58 = vld [vmem:[#allocation3 + $0x60] sm:$0xff]  ;;  %1655 = vst.msk [vmem:[#allocation3 + $0x80] sm:$0xff] %vm726_vm2, %v1623_v56  ;;  %1206 = vst.msk [vmem:[#allocation3 + $0xb8] sm:$0xff] %vm726_vm2, %v1174_v57  ;;  %v1626_v63 = vadd.f32 %v2208_v34, %v1594_v59  ;;  %v1173_v0 = vadd.f32 %v1141_v61, %v1070_v60 }
 0x12d   : > { %1715 = vst.msk [vmem:[%s2683_s12 + $0x60] sm:$0xff] %vm726_vm2, %v1683_v58  ;;  %v1686_v1 = vld [vmem:[#allocation3 + $0x78] sm:$0xff]  ;;  %v1593_v2 = vld [vmem:[#allocation3 + $0x90] sm:$0xff]  ;;  %v2165_v3 = vpop.f32.mrf.mxu1  ;;  %v1526_v5 = vpop.f32.mrf.mxu0 }
 0x12e   : > { %1718 = vst.msk [vmem:[%s2683_s12 + $0x78] sm:$0xff] %vm726_vm2, %v1686_v1  ;;  %1658 = vst.msk [vmem:[#allocation3 + $0x98] sm:$0xff] %vm726_vm2, %v1626_v63  ;;  %v1625_v6 = vadd.f32 %v1593_v2, %v1506_v41  ;;  %v1176_v7 = vadd.f32 %v2165_v3, %v1144_v4 }
 0x12f   : > { %1205 = vst.msk [vmem:[#allocation3 + $0xb0] sm:$0xff] %vm726_vm2, %v1173_v0  ;;  %v1685_v8 = vld [vmem:[#allocation3 + $0x70] sm:$0xff]  ;;  %v1596_v9 = vld [vmem:[#allocation3 + $0xa8] sm:$0xff]  ;;  %v1080_v10 = vpop.f32.mrf.mxu1  ;;  %v2217_v12 = vpop.f32.mrf.mxu0 }
 0x130   : > { %1717 = vst.msk [vmem:[%s2683_s12 + $0x70] sm:$0xff] %vm726_vm2, %v1685_v8  ;;  %1657 = vst.msk [vmem:[#allocation3 + $0x90] sm:$0xff] %vm726_vm2, %v1625_v6  ;;  %v1628_v13 = vadd.f32 %v2211_v48, %v1596_v9  ;;  %v1175_v14 = vadd.f32 %v1143_v11, %v1080_v10 }
 0x131   : > { %1208 = vst.msk [vmem:[#allocation3 + $0xc8] sm:$0xff] %vm726_vm2, %v1176_v7  ;;  %v1688_v15 = vld [vmem:[#allocation3 + $0x88] sm:$0xff]  ;;  %v1595_v16 = vld [vmem:[#allocation3 + $0xa0] sm:$0xff]  ;;  %v2168_v17 = vpop.f32.mrf.mxu1  ;;  %v1536_v19 = vpop.f32.mrf.mxu0 }
 0x132   : > { %1720 = vst.msk [vmem:[%s2683_s12 + $0x88] sm:$0xff] %vm726_vm2, %v1688_v15  ;;  %1660 = vst.msk [vmem:[#allocation3 + $0xa8] sm:$0xff] %vm726_vm2, %v1628_v13  ;;  %v1627_v20 = vadd.f32 %v1595_v16, %v1516_v55  ;;  %v1178_v21 = vadd.f32 %v2168_v17, %v1146_v18 }
 0x133   : > { %1207 = vst.msk [vmem:[#allocation3 + $0xc0] sm:$0xff] %vm726_vm2, %v1175_v14  ;;  %v1687_v22 = vld [vmem:[#allocation3 + $0x80] sm:$0xff]  ;;  %v1598_v23 = vld [vmem:[#allocation3 + $0xb8] sm:$0xff]  ;;  %v1090_v24 = vpop.f32.mrf.mxu1  ;;  %v2220_v26 = vpop.f32.mrf.mxu0 }
 0x134   : > { %1719 = vst.msk [vmem:[%s2683_s12 + $0x80] sm:$0xff] %vm726_vm2, %v1687_v22  ;;  %1659 = vst.msk [vmem:[#allocation3 + $0xa0] sm:$0xff] %vm726_vm2, %v1627_v20  ;;  %v1630_v27 = vadd.f32 %v2214_v62, %v1598_v23  ;;  %v1177_v28 = vadd.f32 %v1145_v25, %v1090_v24 }
 0x135   : > { %1210 = vst.msk [vmem:[#allocation3 + $0xd8] sm:$0xff] %vm726_vm2, %v1178_v21  ;;  %v1690_v29 = vld [vmem:[#allocation3 + $0x98] sm:$0xff]  ;;  %v2171_v31 = vpop.f32.mrf.mxu1  ;;  %v1546_v33 = vpop.f32.mrf.mxu0 }
 0x136   : > { %v1597_v30 = vld [vmem:[#allocation3 + $0xb0] sm:$0xff]  ;;  %1722 = vst.msk [vmem:[%s2683_s12 + $0x98] sm:$0xff] %vm726_vm2, %v1690_v29  ;;  %1662 = vst.msk [vmem:[#allocation3 + $0xb8] sm:$0xff] %vm726_vm2, %v1630_v27  ;;  %v1180_v35 = vadd.f32 %v2171_v31, %v1148_v32 }
 0x137   : > { %1209 = vst.msk [vmem:[#allocation3 + $0xd0] sm:$0xff] %vm726_vm2, %v1177_v28  ;;  %v1629_v34 = vadd.f32 %v1597_v30, %v1526_v5  ;;  %v1689_v36 = vld [vmem:[#allocation3 + $0x90] sm:$0xff]  ;;  %v1100_v38 = vpop.f32.mrf.mxu1  ;;  %v2223_v46 = vpop.f32.mrf.mxu0 }
 0x138   : > { %v1600_v37 = vld [vmem:[#allocation3 + $0xc8] sm:$0xff]  ;;  %1721 = vst.msk [vmem:[%s2683_s12 + $0x90] sm:$0xff] %vm726_vm2, %v1689_v36  ;;  %1212 = vst.msk [vmem:[#allocation3 + $0xe8] sm:$0xff] %vm726_vm2, %v1180_v35  ;;  %v1179_v41 = vadd.f32 %v1147_v39, %v1100_v38 }
 0x139   : > { %1661 = vst.msk [vmem:[#allocation3 + $0xb0] sm:$0xff] %vm726_vm2, %v1629_v34  ;;  %v1632_v40 = vadd.f32 %v2217_v12, %v1600_v37  ;;  %v1692_v42 = vld [vmem:[#allocation3 + $0xa8] sm:$0xff]  ;;  %v2174_v44 = vpop.f32.mrf.mxu1  ;;  %v1556_v57 = vpop.f32.mrf.mxu0 }
 0x13a   : > { %v1599_v43 = vld [vmem:[#allocation3 + $0xc0] sm:$0xff]  ;;  %1724 = vst.msk [vmem:[%s2683_s12 + $0xa8] sm:$0xff] %vm726_vm2, %v1692_v42  ;;  %1211 = vst.msk [vmem:[#allocation3 + $0xe0] sm:$0xff] %vm726_vm2, %v1179_v41  ;;  %v1182_v48 = vadd.f32 %v2174_v44, %v1150_v45 }
 0x13b   : > { %1664 = vst.msk [vmem:[#allocation3 + $0xc8] sm:$0xff] %vm726_vm2, %v1632_v40  ;;  %v1631_v47 = vadd.f32 %v1599_v43, %v1536_v19  ;;  %v1691_v49 = vld [vmem:[#allocation3 + $0xa0] sm:$0xff]  ;;  %v1110_v51 = vpop.f32.mrf.mxu1  ;;  %v2226_v0 = vpop.f32.mrf.mxu0 }
 0x13c   : > { %v1602_v50 = vld [vmem:[#allocation3 + $0xd8] sm:$0xff]  ;;  %1723 = vst.msk [vmem:[%s2683_s12 + $0xa0] sm:$0xff] %vm726_vm2, %v1691_v49  ;;  %1214 = vst.msk [vmem:[#allocation3 + $0xf8] sm:$0xff] %vm726_vm2, %v1182_v48  ;;  %v1181_v54 = vadd.f32 %v1149_v52, %v1110_v51 }
 0x13d   : > { %1663 = vst.msk [vmem:[#allocation3 + $0xc0] sm:$0xff] %vm726_vm2, %v1631_v47  ;;  %v1634_v53 = vadd.f32 %v2220_v26, %v1602_v50  ;;  %v1694_v55 = vld [vmem:[#allocation3 + $0xb8] sm:$0xff]  ;;  %v1566_v6 = vpop.f32.mrf.mxu0 }
 0x13e   : > { %v1601_v56 = vld [vmem:[#allocation3 + $0xd0] sm:$0xff]  ;;  %1726 = vst.msk [vmem:[%s2683_s12 + $0xb8] sm:$0xff] %vm726_vm2, %v1694_v55  ;;  %1213 = vst.msk [vmem:[#allocation3 + $0xf0] sm:$0xff] %vm726_vm2, %v1181_v54 }
 0x13f   : > { %1666 = vst.msk [vmem:[#allocation3 + $0xd8] sm:$0xff] %vm726_vm2, %v1634_v53  ;;  %v1633_v58 = vadd.f32 %v1601_v56, %v1546_v33  ;;  %v1604_v60 = vld [vmem:[#allocation3 + $0xe8] sm:$0xff] }
 0x140   : > { %v1693_v59 = vld [vmem:[#allocation3 + $0xb0] sm:$0xff]  ;;  %v1636_v61 = vadd.f32 %v2223_v46, %v1604_v60 }
 0x141   : > { %1725 = vst.msk [vmem:[%s2683_s12 + $0xb0] sm:$0xff] %vm726_vm2, %v1693_v59  ;;  %1665 = vst.msk [vmem:[#allocation3 + $0xd0] sm:$0xff] %vm726_vm2, %v1633_v58  ;;  %v1603_v63 = vld [vmem:[#allocation3 + $0xe0] sm:$0xff] }
 0x142   : > { %v1696_v62 = vld [vmem:[#allocation3 + $0xc8] sm:$0xff]  ;;  %1668 = vst.msk [vmem:[#allocation3 + $0xe8] sm:$0xff] %vm726_vm2, %v1636_v61  ;;  %v1635_v1 = vadd.f32 %v1603_v63, %v1556_v57 }
 0x143   : > { %1728 = vst.msk [vmem:[%s2683_s12 + $0xc8] sm:$0xff] %vm726_vm2, %v1696_v62  ;;  %v1606_v3 = vld [vmem:[#allocation3 + $0xf8] sm:$0xff] }
 0x144   : > { %v1695_v2 = vld [vmem:[#allocation3 + $0xc0] sm:$0xff]  ;;  %1667 = vst.msk [vmem:[#allocation3 + $0xe0] sm:$0xff] %vm726_vm2, %v1635_v1  ;;  %v1638_v4 = vadd.f32 %v2226_v0, %v1606_v3 }
 0x145   : > { %1727 = vst.msk [vmem:[%s2683_s12 + $0xc0] sm:$0xff] %vm726_vm2, %v1695_v2  ;;  %v1605_v7 = vld [vmem:[#allocation3 + $0xf0] sm:$0xff] }
 0x146   : > { %v1698_v5 = vld [vmem:[#allocation3 + $0xd8] sm:$0xff]  ;;  %1670 = vst.msk [vmem:[#allocation3 + $0xf8] sm:$0xff] %vm726_vm2, %v1638_v4  ;;  %v1637_v8 = vadd.f32 %v1605_v7, %v1566_v6 }
 0x147   : > { %1730 = vst.msk [vmem:[%s2683_s12 + $0xd8] sm:$0xff] %vm726_vm2, %v1698_v5 }
 0x148   : > { %v1697_v9 = vld [vmem:[#allocation3 + $0xd0] sm:$0xff]  ;;  %1669 = vst.msk [vmem:[#allocation3 + $0xf0] sm:$0xff] %vm726_vm2, %v1637_v8 }
 0x149   : > { %1729 = vst.msk [vmem:[%s2683_s12 + $0xd0] sm:$0xff] %vm726_vm2, %v1697_v9  ;;  %v1700_v10 = vld [vmem:[#allocation3 + $0xe8] sm:$0xff] }
 0x14a   : > { %1732 = vst.msk [vmem:[%s2683_s12 + $0xe8] sm:$0xff] %vm726_vm2, %v1700_v10 }
 0x14b   : > { %v1699_v11 = vld [vmem:[#allocation3 + $0xe0] sm:$0xff] }
 0x14c   : > { %1731 = vst.msk [vmem:[%s2683_s12 + $0xe0] sm:$0xff] %vm726_vm2, %v1699_v11 }
 0x14d   : > { %v1702_v12 = vld [vmem:[#allocation3 + $0xf8] sm:$0xff] }
 0x14e   : > { %1734 = vst.msk [vmem:[%s2683_s12 + $0xf8] sm:$0xff] %vm726_vm2, %v1702_v12 }
 0x14f   : > { %v1701_v13 = vld [vmem:[#allocation3 + $0xf0] sm:$0xff] }
 0x150   : > { %1733 = vst.msk [vmem:[%s2683_s12 + $0xf0] sm:$0xff] %vm726_vm2, %v1701_v13 }
 0x151 PF: > { %s13_s14 = sadd.s32 1, %s2280_s14   ;;  %s2815_s12 = smov %s2276_s13 }
 0x152   : > { %p10_p5 = scmp.ge.s32.totalorder %s13_s14, 4   ;;  %s2816_s13 = smov %s2818_s15 }
 0x154   :  { %12 = sbr.rel (!%p10_p5) target bundleno = 2 (0x2), region = 70 }

</bundles_post_ra>
